<compile_context>
chip_gen: v6e
topology: v6e:2x2x1
jax: 0.10.0
libtpu: 0.0.40
codegen_flags: <defaults>
</compile_context>

<pallas_src>
import functools
import math

import jax
import jax.numpy as jnp
from jax.experimental import pallas as pl
from jax.experimental.pallas import tpu as pltpu


def _rmsnorm_kernel(x_ref, w_ref, o_ref, *, eps):
    # x_ref: (tile_rows, dim), w_ref: (1, dim), o_ref: (tile_rows, dim)
    x = x_ref[...].astype(jnp.float32)                     # x.float()
    ms = jnp.mean(x * x, axis=-1, keepdims=True)           # mean of squares (VPU + XLU)
    inv = jax.lax.rsqrt(ms + eps)                          # EUP rsqrt (free slot)
    normed = (x * inv).astype(x_ref.dtype)                 # .type_as(x)
    # weight * normed promotes to result_type(weight, x) exactly like torch.
    o_ref[...] = (w_ref[...] * normed).astype(o_ref.dtype)


def _sublane_multiple(dtype):
    # Natural sublane packing: 8 rows for 4-byte, 16 for 2-byte, 32 for 1-byte.
    itemsize = jnp.dtype(dtype).itemsize
    return max(8, 32 // max(1, itemsize))


def _vmem_capacity_bytes():
    try:
        return int(pltpu.get_tpu_info().vmem_capacity_bytes)
    except Exception:
        # Conservative fallback (v7x has 64 MiB/TC, v5e/v6e have 128 MiB).
        return 64 * 1024 * 1024


def llama_fixed_rmsnorm(x, weight, eps=1e-6, tile_rows=None):
    """x: (..., dim); weight: (dim,). Returns promote(weight.dtype, x.dtype) array."""
    dim = x.shape[-1]
    lead_shape = x.shape[:-1]
    rows = int(math.prod(lead_shape)) if lead_shape else 1
    out_dtype = jnp.result_type(weight.dtype, x.dtype)

    x2d = x.reshape(rows, dim)
    w2d = weight.reshape(1, dim)

    sub = _sublane_multiple(x.dtype)
    x_bytes = jnp.dtype(x.dtype).itemsize
    o_bytes = jnp.dtype(out_dtype).itemsize
    bytes_per_row = dim * (x_bytes + o_bytes)

    # Size the tile against a per-chip VMEM budget (double-buffered in + out tiles).
    vmem_cap = _vmem_capacity_bytes()
    vmem_budget = int(vmem_cap * 0.6)
    max_tile_rows = max(sub, vmem_budget // (2 * bytes_per_row))

    if tile_rows is None:
        tile_rows = 512                      # big enough to amortize ~0.35 us/step
    tile_rows = min(int(tile_rows), max_tile_rows)
    tile_rows = max(sub, (tile_rows // sub) * sub)   # respect sublane packing

    # Pad rows so the grid divides evenly (never fall back to a single huge block).
    if rows <= tile_rows:
        padded_rows = ((rows + sub - 1) // sub) * sub
        tile_rows = padded_rows
    else:
        padded_rows = ((rows + tile_rows - 1) // tile_rows) * tile_rows

    if padded_rows != rows:
        # Zero padding is safe: mean(0)=0, rsqrt(eps) finite, 0 * finite = 0.
        x2d = jnp.pad(x2d, ((0, padded_rows - rows), (0, 0)))

    grid = (padded_rows // tile_rows,)

    # Explicit scoped-VMEM limit: double-buffered x/out tiles + resident weight,
    # with ~2x headroom, capped below physical capacity.
    working = 2 * tile_rows * bytes_per_row + 2 * dim * jnp.dtype(weight.dtype).itemsize
    vmem_limit = int(min(vmem_cap * 0.9, max(32 * 1024 * 1024, working * 2)))

    cost = pl.CostEstimate(
        flops=3 * rows * dim,            # square, multiply-by-inv, scale-by-weight
        transcendentals=rows,            # one rsqrt per row
        bytes_accessed=(padded_rows * dim * x_bytes
                        + padded_rows * dim * o_bytes
                        + dim * jnp.dtype(weight.dtype).itemsize),
    )

    out = pl.pallas_call(
        functools.partial(_rmsnorm_kernel, eps=eps),
        out_shape=jax.ShapeDtypeStruct((padded_rows, dim), out_dtype),
        grid_spec=pltpu.PrefetchScalarGridSpec(
            num_scalar_prefetch=0,
            grid=grid,
            in_specs=[
                # x tile: (tile_rows, dim); dim == full last axis (lane-dense).
                pl.BlockSpec((tile_rows, dim), lambda i: (i, 0)),
                # weight: constant index_map -> kept resident in VMEM, no re-DMA.
                pl.BlockSpec((1, dim), lambda i: (0, 0)),
            ],
            out_specs=pl.BlockSpec((tile_rows, dim), lambda i: (i, 0)),
        ),
        compiler_params=pltpu.CompilerParams(
            dimension_semantics=("parallel",),   # shards row grid across TCs on v7x
            vmem_limit_bytes=vmem_limit,
        ),
        cost_estimate=cost,
    )(x2d, w2d)

    if padded_rows != rows:
        out = out[:rows]
    return out.reshape(*lead_shape, dim)


def _reference(x, weight, eps=1e-6):
    xf = x.astype(jnp.float32)
    normed = (xf * jax.lax.rsqrt(jnp.mean(xf * xf, axis=-1, keepdims=True) + eps)).astype(x.dtype)
    return weight * normed


if __name__ == "__main__":
    batch, seq, hidden = 2, 8, 32
    key = jax.random.PRNGKey(0)
    x = jax.random.normal(key, (batch, seq, hidden), dtype=jnp.float32)

    # Matches nn.Parameter(torch.ones(dim)).
    weight = jnp.ones((hidden,), dtype=jnp.float32)
    eps = 1e-6

    y = llama_fixed_rmsnorm(x, weight, eps)
    y = jax.block_until_ready(y)

    y_ref = _reference(x, weight, eps)
    assert y.shape == x.shape
    assert y.dtype == jnp.result_type(weight.dtype, x.dtype)
    assert jnp.allclose(y, y_ref, atol=1e-5, rtol=1e-5)

    # Also exercise a ragged / larger shape + bf16 path to validate padding & tiling.
    xb = jax.random.normal(jax.random.PRNGKey(1), (3, 37, 256), dtype=jnp.bfloat16)
    wb = jnp.ones((256,), dtype=jnp.float32)
    yb = jax.block_until_ready(llama_fixed_rmsnorm(xb, wb, eps))
    yb_ref = _reference(xb, wb, eps)
    assert yb.shape == xb.shape
    assert jnp.allclose(yb.astype(jnp.float32), yb_ref.astype(jnp.float32), atol=2e-2, rtol=2e-2)

    print("KERNEL_OK")
</pallas_src>

<mosaic_0001>
module attributes {stable_mosaic.version = 11 : i64} {
  func.func @_rmsnorm_kernel(%arg0: i32, %arg1: memref<16x32xf32, #tpu.memory_space<vmem>>, %arg2: memref<1x32xf32, #tpu.memory_space<vmem>>, %arg3: memref<16x32xf32, #tpu.memory_space<vmem>>) attributes {dimension_semantics = [#tpu.dimension_semantics<parallel>], iteration_bounds = array<i64: 1>, scalar_prefetch = 0 : i64, scratch_operands = 0 : i64, tpu.core_type = #tpu.core_type<tc>, window_params = [{transform_indices = @transform_0, window_bounds = array<i64: 16, 32>}, {pipeline_mode = #tpu.pipeline_mode<synchronous>, transform_indices = @transform_1, window_bounds = array<i64: 1, 32>}, {transform_indices = @transform_2, window_bounds = array<i64: 16, 32>}]} {
    %c0 = arith.constant 0 : index
    %c0_0 = arith.constant 0 : index
    %0 = vector.load %arg1[%c0, %c0_0] : memref<16x32xf32, #tpu.memory_space<vmem>>, vector<16x32xf32>
    %1 = arith.mulf %0, %0 : vector<16x32xf32>
    %cst = arith.constant dense<0.000000e+00> : vector<16xf32>
    %2 = vector.multi_reduction <add>, %1, %cst [1] : vector<16x32xf32> to vector<16xf32>
    %3 = vector.shape_cast %2 : vector<16xf32> to vector<16x1xf32>
    %cst_1 = arith.constant 3.200000e+01 : f32
    %4 = vector.broadcast %cst_1 : f32 to vector<16x1xf32>
    %5 = arith.divf %3, %4 : vector<16x1xf32>
    %cst_2 = arith.constant 9.99999997E-7 : f32
    %6 = vector.broadcast %cst_2 : f32 to vector<16x1xf32>
    %7 = arith.addf %5, %6 : vector<16x1xf32>
    %8 = math.rsqrt %7 : vector<16x1xf32>
    %9 = vector.broadcast %8 : vector<16x1xf32> to vector<16x32xf32>
    %10 = arith.mulf %0, %9 : vector<16x32xf32>
    %c0_3 = arith.constant 0 : index
    %c0_4 = arith.constant 0 : index
    %11 = vector.load %arg2[%c0_3, %c0_4] : memref<1x32xf32, #tpu.memory_space<vmem>>, vector<1x32xf32>
    %12 = vector.broadcast %11 : vector<1x32xf32> to vector<16x32xf32>
    %13 = arith.mulf %12, %10 : vector<16x32xf32>
    %c0_5 = arith.constant 0 : index
    %c0_6 = arith.constant 0 : index
    %14 = vector.load %arg3[%c0_5, %c0_6] : memref<16x32xf32, #tpu.memory_space<vmem>>, vector<16x32xf32>
    tpu.vector_store %arg3[%c0_5, %c0_6], %13 {strides = array<i32>} : memref<16x32xf32, #tpu.memory_space<vmem>>, vector<16x32xf32>,
    return
  }
  func.func @transform_0(%arg0: i32) -> (i32, i32) {
    %c0_i32 = arith.constant 0 : i32
    %c0_i32_0 = arith.constant 0 : i32
    return %arg0, %c0_i32 : i32, i32
  }
  func.func @transform_1(%arg0: i32) -> (i32, i32) {
    %c0_i32 = arith.constant 0 : i32
    %c0_i32_0 = arith.constant 0 : i32
    %c0_i32_1 = arith.constant 0 : i32
    return %c0_i32, %c0_i32_0 : i32, i32
  }
  func.func @transform_2(%arg0: i32) -> (i32, i32) {
    %c0_i32 = arith.constant 0 : i32
    %c0_i32_0 = arith.constant 0 : i32
    return %arg0, %c0_i32 : i32, i32
  }
}

</mosaic_0001>

<bundles_post_ra>
// kernel: tpu_custom_call.1
= control target key start
LH: loop header
LB: loop body
LE: loop exit
PB: predicated region body
PF: predicated region fallthrough
CT: control target
= control target key end

     0   :  { %7 = vsyncpa [#allocation3], 0  ;;  %s165_s0 = inlined_call_operand.hbm [shape: f32[16,32], index: 0, kind: input, shape index: {}]   ;;  %s166_s1 = inlined_call_operand.vmem [shape: f32[1,32], index: 1, kind: input, shape index: {}]   ;;  %s167_s2 = inlined_call_operand.hbm [shape: f32[16,32], index: 2, kind: output, shape index: {}]  }
   0x1   :  { %8 = vsyncpa [#allocation4], 0  ;;  %s127_s9 = smov [#allocation2]  }
   0x2   :  { %s14_s10 = sshll.u32 %s127_s9, 4  ;;  %s15_s10 = int_to_ptr.vmem [resolvable:$true] %s14_s10 }
   0x3   :  { %s91_s11 = scalar_lea.vmem %s15_s10, 256  ;;  %p96_p1 = scmp.lt.s32.totalorder %s15_s10, %s15_s10 }
   0x4   :  { %p92_p0 = scmp.ne.s32.totalorder %s15_s10, %s91_s11  ;;  %p97_p2 = scmp.lt.s32.totalorder %s91_s11, %s91_s11 }
   0x6   :  { %p98_p3 = por %p97_p2, %p96_p1 }
   0x8   :  { %p99_p4 = pnand %p98_p3, %p92_p0 }
   0xa   :  { %102 = shalt.err (!%p99_p4)
}
   0xb   :  { %s128_s12 = smov 128   ;;  %s129_s13 = smov 8  }
   0xc   :  { %20 = dma.hbm_to_vmem [thread:$0]  %s165_s0, 256, %s15_s10, [#allocation3], %s128_s12, %s128_s12, %s129_s13  }
   0xd   :  { %123 = dma.done.wait [#allocation3], 256  }
   0xe   :  { %124 = vsyncadd [#allocation3], 4294967040  ;;  %v26_v0 = vld [vmem:[#allocation2] sm:$0xff]  ;;  %vm30_vm0 = vcmask 261120   ;;  %v27_v1 = vld [vmem:[#allocation2 + $0x8] sm:$0xff]  ;;  %s130_s17 = smov [#allocation5]  }
   0xf   :  { %v28_v2 = vmul.f32 %v26_v0, %v26_v0  ;;  %v29_v3 = vmul.f32 %v27_v1, %v27_v1  ;;  %v74_v13 = vld [vmem:[%s166_s1] ss:$0 sm:$0xff]  ;;  %s62_s18 = sshll.u32 %s130_s17, 4  ;;  %s63_s18 = int_to_ptr.vmem [resolvable:$true] %s62_s18 }
  0x10   :  { %s103_s19 = scalar_lea.vmem %s63_s18, 256  ;;  %p108_p6 = scmp.lt.s32.totalorder %s63_s18, %s63_s18 }
  0x11   :  { %v31_v4 = vsel %vm30_vm0, %v28_v2, 0.0  ;;  %v34_v5 = vsel %vm30_vm0, %v29_v3, 0.0  ;;  %p104_p5 = scmp.ne.s32.totalorder %s63_s18, %s103_s19  ;;  %p109_p7 = scmp.lt.s32.totalorder %s103_s19, %s103_s19 }
  0x12   :  { %32 = vadd.xlane.f32.xlu0 %v31_v4 }
  0x13   :  { %p110_p8 = por %p109_p7, %p108_p6 }
  0x15   :  { %p111_p9 = pnand %p110_p8, %p104_p5 }
  0x16   :  { %35 = vadd.xlane.f32.xlu0 %v34_v5 }
  0x9b   :  { %v33_v6 = vpop.xlane.xlu0 %32 }
  0x9c   :  { %v38_v7 = vmul.f32 0.03125, %v33_v6 }
  0x9e   :  { %v40_v8 = vadd.f32 1e-06, %v38_v7 }
  0x9f   :  { %v36_v9 = vpop.xlane.xlu0 %35 }
  0xa0   :  { %79 = vrsqrt.f32 %v40_v8  ;;  %v39_v10 = vmul.f32 0.03125, %v36_v9 }
  0xa2   :  { %v41_v11 = vadd.f32 1e-06, %v39_v10 }
  0xa4   :  { %81 = vrsqrt.f32 %v41_v11 }
  0xad   :  { %v80_v12 = vpop.eup %79 }
  0xae   :  { %v44_v14 = vmul.f32 %v80_v12, %v26_v0 }
  0xb0   :  { %v53_v15 = vmul.f32 %v74_v13, %v44_v14 }
  0xb1   :  { %v82_v16 = vpop.eup %81 }
  0xb2   :  { %v45_v17 = vmul.f32 %v82_v16, %v27_v1  ;;  %55 = vst.msk [vmem:[#allocation5] sm:$0xff] %vm30_vm0, %v53_v15 }
  0xb4   :  { %v54_v18 = vmul.f32 %v74_v13, %v45_v17 }
  0xb6   :  { %56 = vst.msk [vmem:[#allocation5 + $0x8] sm:$0xff] %vm30_vm0, %v54_v18 }
  0xb7   :  { %114 = shalt.err (!%p111_p9)
}
  0xb8   :  { %68 = dma.vmem_to_hbm [thread:$0]  %s63_s18, 256, %s167_s2, [#allocation4], %s128_s12, %s128_s12, %s129_s13  }
  0xb9   :  { %125 = dma.done.wait [#allocation4], 256  }
  0xba   :  { %126 = vsyncadd [#allocation4], 4294967040 }
  0xbb   :  { %72 = vsyncpa [#allocation3], 1 }
  0xbc   :  { %73 = vsyncpa [#allocation4], 1 }

</bundles_post_ra>
